<compile_context>
chip_gen: v7x
topology: tpu7x:2x2x1
jax: 0.10.0
libtpu: 0.0.40
codegen_flags: <defaults>
</compile_context>

<pallas_src>
import jax
import jax.numpy as jnp
from jax.experimental import pallas as pl
from jax.experimental.pallas import tpu as pltpu


def _rbm_fwd_kernel(v_ref, w_ref, c_ref, o_ref):
    # v_ref: [TB, V] bf16, w_ref: [V, Hp] bf16, c_ref: [1, Hp] f32
    pre = jnp.dot(v_ref[...], w_ref[...],
                  preferred_element_type=jnp.float32) + c_ref[...]
    o_ref[...] = jax.nn.sigmoid(pre).astype(o_ref.dtype)


def rbm_forward(visible, W, c, scale=1.0, block_b=256):
    """RBM hidden-unit activation.

    visible: [B, V] float; W: [H, V] (PyTorch layout); c: [H] -> [B, H] f32.
    """
    B, V = visible.shape
    H = W.shape[0]

    # --- pad hidden dim to a lane-dense multiple of 128 -------------------
    Hp = ((H + 127) // 128) * 128
    # --- batch tiling ------------------------------------------------------
    TB = min(block_b, ((B + 7) // 8) * 8)
    Bp = ((B + TB - 1) // TB) * TB

    # Fold scale, transpose W to [V, H], zero-pad (padded lanes are inert
    # because the extra W columns and c entries are zero and get sliced off).
    wt = jnp.zeros((V, Hp), jnp.float32).at[:, :H].set(W.T * scale)
    c2 = jnp.zeros((1, Hp), jnp.float32).at[0, :H].set(c * scale)

    v_pad = jnp.zeros((Bp, V), jnp.float32).at[:B, :].set(visible)

    # bf16 MXU operands, f32 accumulation.
    v_bf16 = v_pad.astype(jnp.bfloat16)
    wt_bf16 = wt.astype(jnp.bfloat16)

    grid = (Bp // TB,)

    cost = pl.CostEstimate(
        flops=2 * Bp * V * Hp,
        transcendentals=Bp * Hp,                       # sigmoid -> exp
        bytes_accessed=(Bp * V * 2 + V * Hp * 2 + Hp * 4 + Bp * Hp * 4),
    )

    # Generous VMEM budget: double-buffered inputs/outputs + resident weights.
    vmem_bytes = 2 * (2 * TB * V * 2 + V * Hp * 2 + Hp * 4 + 2 * TB * Hp * 4)
    vmem_limit = min(max(vmem_bytes, 8 * 1024 * 1024), 48 * 1024 * 1024)

    out_padded = pl.pallas_call(
        _rbm_fwd_kernel,
        out_shape=jax.ShapeDtypeStruct((Bp, Hp), jnp.float32),
        grid_spec=pltpu.PrefetchScalarGridSpec(
            num_scalar_prefetch=0,
            grid=grid,
            in_specs=[
                pl.BlockSpec((TB, V), lambda i: (i, 0)),   # visible tile
                pl.BlockSpec((V, Hp), lambda i: (0, 0)),   # W^T (resident)
                pl.BlockSpec((1, Hp), lambda i: (0, 0)),   # c   (resident)
            ],
            out_specs=pl.BlockSpec((TB, Hp), lambda i: (i, 0)),
        ),
        compiler_params=pltpu.CompilerParams(
            dimension_semantics=("parallel",),             # megacore on v7x
            vmem_limit_bytes=vmem_limit,
        ),
        cost_estimate=cost,
    )(v_bf16, wt_bf16, c2)

    return out_padded[:B, :H]


if __name__ == "__main__":
    # Small shapes consistent with RestrictedBoltzmannMachine(V, H)
    B, V_in, H_out = 8, 64, 32
    scale = 1.0

    key = jax.random.PRNGKey(0)
    kv, kw, kc = jax.random.split(key, 3)

    visible = (jax.random.uniform(kv, (B, V_in)) > 0.5).astype(jnp.float32)
    W = 0.1 * jax.random.normal(kw, (H_out, V_in), dtype=jnp.float32)  # [H, V]
    c = 0.1 * jax.random.normal(kc, (H_out,), dtype=jnp.float32)

    out = rbm_forward(visible, W, c, scale=scale)
    jax.block_until_ready(out)

    # pure-JAX f32 reference:  sigmoid((v @ W^T + c) * scale)
    ref = jax.nn.sigmoid((visible @ W.T + c) * scale)

    assert out.shape == (B, H_out)
    # bf16 MXU operands vs f32 reference -> loose-but-tight tolerance
    assert jnp.max(jnp.abs(out - ref)) < 2e-2, jnp.max(jnp.abs(out - ref))

    print("KERNEL_OK")
</pallas_src>

<mosaic_0001>
module attributes {stable_mosaic.version = 11 : i64} {
  func.func @_rbm_fwd_kernel(%arg0: i32, %arg1: memref<8x64xbf16, #tpu.memory_space<vmem>>, %arg2: memref<64x128xbf16, #tpu.memory_space<vmem>>, %arg3: memref<1x128xf32, #tpu.memory_space<vmem>>, %arg4: memref<8x128xf32, #tpu.memory_space<vmem>>) attributes {dimension_semantics = [#tpu.dimension_semantics<parallel>], iteration_bounds = array<i64: 1>, scalar_prefetch = 0 : i64, scratch_operands = 0 : i64, tpu.core_type = #tpu.core_type<tc>, window_params = [{transform_indices = @transform_0, window_bounds = array<i64: 8, 64>}, {pipeline_mode = #tpu.pipeline_mode<synchronous>, transform_indices = @transform_1, window_bounds = array<i64: 64, 128>}, {pipeline_mode = #tpu.pipeline_mode<synchronous>, transform_indices = @transform_2, window_bounds = array<i64: 1, 128>}, {transform_indices = @transform_3, window_bounds = array<i64: 8, 128>}]} {
    %c0 = arith.constant 0 : index
    %c0_0 = arith.constant 0 : index
    %0 = vector.load %arg1[%c0, %c0_0] : memref<8x64xbf16, #tpu.memory_space<vmem>>, vector<8x64xbf16>
    %c0_1 = arith.constant 0 : index
    %c0_2 = arith.constant 0 : index
    %1 = vector.load %arg2[%c0_1, %c0_2] : memref<64x128xbf16, #tpu.memory_space<vmem>>, vector<64x128xbf16>
    %cst = arith.constant dense<0.000000e+00> : vector<8x128xf32>
    %2 = tpu.matmul %0, %1, %cst {dimension_numbers = #tpu.dot_dimension_numbers<[1], [0], [0], [1], [0, 0, 1, 1], [], []>} : vector<8x64xbf16>, vector<64x128xbf16>, vector<8x128xf32> -> vector<8x128xf32>
    %c0_3 = arith.constant 0 : index
    %c0_4 = arith.constant 0 : index
    %3 = vector.load %arg3[%c0_3, %c0_4] : memref<1x128xf32, #tpu.memory_space<vmem>>, vector<1x128xf32>
    %4 = vector.broadcast %3 : vector<1x128xf32> to vector<8x128xf32>
    %5 = arith.addf %2, %4 : vector<8x128xf32>
    %6 = arith.negf %5 : vector<8x128xf32>
    %7 = math.exp %6 : vector<8x128xf32>
    %cst_5 = arith.constant 1.000000e+00 : f32
    %8 = vector.broadcast %cst_5 : f32 to vector<8x128xf32>
    %9 = arith.addf %8, %7 : vector<8x128xf32>
    %10 = arith.divf %8, %9 : vector<8x128xf32>
    %c0_6 = arith.constant 0 : index
    %c0_7 = arith.constant 0 : index
    %11 = vector.load %arg4[%c0_6, %c0_7] : memref<8x128xf32, #tpu.memory_space<vmem>>, vector<8x128xf32>
    tpu.vector_store %arg4[%c0_6, %c0_7], %10 {strides = array<i32>} : memref<8x128xf32, #tpu.memory_space<vmem>>, vector<8x128xf32>,
    return
  }
  func.func @transform_0(%arg0: i32) -> (i32, i32) {
    %c0_i32 = arith.constant 0 : i32
    %c0_i32_0 = arith.constant 0 : i32
    return %arg0, %c0_i32 : i32, i32
  }
  func.func @transform_1(%arg0: i32) -> (i32, i32) {
    %c0_i32 = arith.constant 0 : i32
    %c0_i32_0 = arith.constant 0 : i32
    %c0_i32_1 = arith.constant 0 : i32
    return %c0_i32, %c0_i32_0 : i32, i32
  }
  func.func @transform_2(%arg0: i32) -> (i32, i32) {
    %c0_i32 = arith.constant 0 : i32
    %c0_i32_0 = arith.constant 0 : i32
    %c0_i32_1 = arith.constant 0 : i32
    return %c0_i32, %c0_i32_0 : i32, i32
  }
  func.func @transform_3(%arg0: i32) -> (i32, i32) {
    %c0_i32 = arith.constant 0 : i32
    %c0_i32_0 = arith.constant 0 : i32
    return %arg0, %c0_i32 : i32, i32
  }
}

</mosaic_0001>

<bundles_post_ra>
// kernel: tpu_custom_call.1
= control target key start
LH: loop header
LB: loop body
LE: loop exit
PB: predicated region body
PF: predicated region fallthrough
CT: control target
= control target key end

     0   :  { %8 = vsyncpa [#allocation3], 0  ;;  %s333_s0 = inlined_call_operand.hbm [shape: bf16[8,64], index: 0, kind: input, shape index: {}]   ;;  %s334_s1 = inlined_call_operand.hbm [shape: bf16[64,128], index: 1, kind: input, shape index: {}]   ;;  %s335_s2 = inlined_call_operand.vmem [shape: f32[1,128], index: 2, kind: input, shape index: {}]   ;;  %s336_s3 = inlined_call_operand.hbm [shape: f32[8,128], index: 3, kind: output, shape index: {}]  }
   0x1   :  { %9 = vsyncpa [#allocation6], 0 }
   0x2   :  { %10 = vsyncpa [#allocation4], 0  ;;  %s260_s12 = smov [#allocation2]   ;;  %s261_s14 = smov [#allocation5]  }
   0x3   :  { %s17_s13 = sshll.u32 %s260_s12, 4  ;;  %s26_s15 = sshll.u32 %s261_s14, 4  ;;  %s18_s13 = int_to_ptr.vmem [resolvable:$true] %s17_s13  ;;  %s287_s15 = int_to_ptr.vmem [resolvable:$true] %s26_s15 }
   0x4   :  { %s188_s18 = scalar_lea.hbm %s333_s0, 64 }
   0x5   :  { %p189_p0 = scmp.ne.s32.totalorder %s333_s0, %s188_s18  ;;  %p192_p1 = scmp.lt.u32.totalorder %s188_s18, %s333_s0 }
   0x7   :  { %p194_p2 = pnand %p192_p1, %p189_p0 }
   0x9   :  { %197 = shalt.err (!%p194_p2)
}
   0xa   :  { %s198_s23 = scalar_lea.vmem %s18_s13, 64  ;;  %p203_p4 = scmp.lt.s32.totalorder %s18_s13, %s18_s13 }
   0xb   :  { %p199_p3 = scmp.ne.s32.totalorder %s18_s13, %s198_s23  ;;  %p204_p5 = scmp.lt.s32.totalorder %s198_s23, %s198_s23 }
   0xd   :  { %p205_p6 = por %p204_p5, %p203_p4 }
   0xf   :  { %p206_p7 = pnand %p205_p6, %p199_p3 }
  0x11   :  { %209 = shalt.err (!%p206_p7)
}
  0x12   :  { %20 = dma.hbm_to_vmem [thread:$0]  %s333_s0, 64, %s18_s13, [#allocation3]  }
  0x13   :  { %s210_s28 = scalar_lea.hbm %s334_s1, 512 }
  0x14   :  { %p211_p8 = scmp.ne.s32.totalorder %s334_s1, %s210_s28  ;;  %p214_p9 = scmp.lt.u32.totalorder %s210_s28, %s334_s1 }
  0x16   :  { %p216_p10 = pnand %p214_p9, %p211_p8 }
  0x18   :  { %219 = shalt.err (!%p216_p10)
}
  0x19   :  { %s220_s6 = scalar_lea.vmem %s287_s15, 512  ;;  %p225_p12 = scmp.lt.s32.totalorder %s287_s15, %s287_s15 }
  0x1a   :  { %p221_p11 = scmp.ne.s32.totalorder %s287_s15, %s220_s6  ;;  %p226_p13 = scmp.lt.s32.totalorder %s220_s6, %s220_s6 }
  0x1c   :  { %p227_p0 = por %p226_p13, %p225_p12 }
  0x1e   :  { %p228_p1 = pnand %p227_p0, %p221_p11 }
  0x20   :  { %231 = shalt.err (!%p228_p1)
}
  0x21   :  { %s262_s0 = smov 64   ;;  %s263_s7 = smov 4  }
  0x22   :  { %32 = dma.hbm_to_vmem [thread:$0]  %s334_s1, 512, %s287_s15, [#allocation6], %s262_s0, %s262_s0, %s263_s7  }
  0x23   :  { %254 = dma.done.wait [#allocation3], 64  }
  0x24   :  { %255 = vsyncadd [#allocation3], 4294967232 }
  0x25   :  { %256 = dma.done.wait [#allocation6], 512  }
  0x26   :  { %257 = vsyncadd [#allocation6], 4294966784  ;;  %v264_v0 = vmov 0.0   ;;  %vm265_vm0 = vmmov 0   ;;  %v180_v1 = vld [vmem:[#allocation5] sm:$0xff]   ;;  %v181_v2 = vld [vmem:[#allocation5 + $0x8] sm:$0xff]  }
  0x27   :  { %161 = vmatprep.subr.bf16.mxu0 %v264_v0  ;;  %169 = vmatprep.mubr.msk.bf16.mxu0 %vm265_vm0, %v264_v0  ;;  %v182_v3 = vld [vmem:[#allocation5 + $0x10] sm:$0xff]   ;;  %v183_v4 = vld [vmem:[#allocation5 + $0x18] sm:$0xff]   ;;  %vm82_vm1 = vcmask 523264   ;;  %s266_s11 = smov [#allocation7]  }
  0x28   :  { %162 = vmatpush3.bf16.msra.mxu0 %v180_v1  ;;  %v42_v5 = vld [vmem:[#allocation2] sm:$0xf]  ;;  %s139_s12 = sshll.u32 %s266_s11, 4  ;;  %s140_s12 = int_to_ptr.vmem [resolvable:$true] %s139_s12 }
  0x29   :  { %163 = vmatprep.subr.bf16.mxu0 %v264_v0  ;;  %v149_v6 = vld [vmem:[%s335_s2] ss:$0 sm:$0xff]  ;;  %s232_s13 = scalar_lea.vmem %s140_s12, 128  ;;  %p237_p3 = scmp.lt.s32.totalorder %s140_s12, %s140_s12 }
  0x2a   :  { %p233_p2 = scmp.ne.s32.totalorder %s140_s12, %s232_s13  ;;  %p238_p4 = scmp.lt.s32.totalorder %s232_s13, %s232_s13 }
  0x2c   :  { %164 = vmatpush3.bf16.msra.mxu0 %v181_v2  ;;  %p239_p5 = por %p238_p4, %p237_p3 }
  0x2d   :  { %165 = vmatprep.subr.bf16.mxu0 %v264_v0 }
  0x2e   :  { %p240_p6 = pnand %p239_p5, %p233_p2 }
  0x30   :  { %166 = vmatpush3.bf16.msra.mxu0 %v182_v3 }
  0x31   :  { %167 = vmatprep.subr.bf16.mxu0 %v264_v0 }
  0x34   :  { %168 = vmatpush3.bf16.msra.mxu0 %v183_v4 }
  0x37   :  { %170 = vmatmul.mubr.msk.bf16.vlgmr.msra.gmra.mrb[0].mxu0 %vm82_vm1, %v42_v5 }
 0x10a   :  { %v120_v7 = vpop.f32.mrb[0].mxu0 }
 0x10b   :  { %v121_v8 = vadd.f32 %v149_v6, %v120_v7  ;;  %v171_v9 = vpop.f32.mrb[1].mxu0 }
 0x10c   :  { %v123_v10 = vpop.f32.mrb[2].mxu0 }
 0x10d   :  { %v155_v11 = vmul.f32 -1.442695, %v121_v8  ;;  %v172_v12 = vpop.f32.mrb[3].mxu0 }
 0x10f   :  { %184 = vpow2.f32 %v155_v11 }
 0x119   :  { %v185_v13 = vpop.eup %184 }
 0x11a   :  { %v129_v14 = vadd.f32 1.0, %v185_v13 }
 0x11c   :  { %186 = vrcp.f32 %v129_v14 }
 0x126   :  { %v187_v15 = vpop.eup %186 }
 0x127   :  { %132 = vst [vmem:[#allocation7] sm:$0xff] %v187_v15 }
 0x128   :  { %243 = shalt.err (!%p240_p6)
}
 0x129   :  { %s244_s15 = scalar_lea.hbm %s336_s3, 128 }
 0x12a   :  { %p245_p7 = scmp.ne.s32.totalorder %s336_s3, %s244_s15  ;;  %p248_p8 = scmp.lt.u32.totalorder %s244_s15, %s336_s3 }
 0x12c   :  { %p250_p9 = pnand %p248_p8, %p245_p7 }
 0x12e   :  { %253 = shalt.err (!%p250_p9)
}
 0x12f   :  { %142 = dma.vmem_to_hbm [thread:$0]  %s140_s12, 128, %s336_s3, [#allocation4]  }
 0x130   :  { %258 = dma.done.wait [#allocation4], 128  }
 0x131   :  { %259 = vsyncadd [#allocation4], 4294967168 }
 0x132   :  { %146 = vsyncpa [#allocation3], 1 }
 0x133   :  { %147 = vsyncpa [#allocation6], 1 }
 0x134   :  { %148 = vsyncpa [#allocation4], 1 }

</bundles_post_ra>
